<compile_context>
chip_gen: v7x
topology: tpu7x:2x2x1
jax: 0.10.0
libtpu: 0.0.40
codegen_flags: <defaults>
</compile_context>

<pallas_src>
import functools

import jax
import jax.numpy as jnp
from jax.experimental import pallas as pl
from jax.experimental.pallas import tpu as pltpu


# ----------------------------- tile selection -------------------------------

_VMEM_LIMIT_BYTES = 40 * 1024 * 1024    # <= safe on v7x (64 MiB physical)
_BLOCK_BYTES_TARGET = 8 * 1024 * 1024   # ~HBM-roofline plateau per input block
_TILE_VMEM_BUDGET = 28 * 1024 * 1024    # pipelined footprint (in+out dbl-buf + f32 tmp)


def _sublane_multiple(dtype):
    itemsize = jnp.dtype(dtype).itemsize
    return max(8, 32 // itemsize)        # 8 for f32, 16 for bf16, 32 for int8/fp8


def _choose_row_tile(n_rows, n_feat, dtype):
    """Row tile for the standalone LN kernel (block-byte based, generation-safe)."""
    itemsize = jnp.dtype(dtype).itemsize
    sub = _sublane_multiple(dtype)
    row_bytes_in = n_feat * itemsize
    # in + out blocks, double-buffered, plus ~2 single-buffered f32 rows of
    # in-kernel working set (x cast + (x-mean) temp).
    per_row_pipelined = 2 * 2 * row_bytes_in + 2 * 4 * n_feat
    tr = min(_BLOCK_BYTES_TARGET // max(row_bytes_in, 1),
             _TILE_VMEM_BUDGET // max(per_row_pipelined, 1))
    rows_rounded = -(-n_rows // sub) * sub
    # >= 2 grid blocks whenever rows permit so v7x's 2 TensorCores both get work.
    if rows_rounded >= 2 * sub:
        tr = min(tr, rows_rounded // 2)
    tr = max(sub, (int(tr) // sub) * sub)
    return min(tr, rows_rounded)


def _choose_fused_tiles(n_rows, n_feat, dtype):
    """(tm, tn) tiles for the fused LN -> matmul -> +residual kernel."""
    sub = _sublane_multiple(dtype)
    rows_rounded = -(-n_rows // sub) * sub
    tm = 256
    if rows_rounded >= 2 * sub:
        tm = min(tm, rows_rounded // 2)          # >= 2 row blocks (v7x dual-TC)
    tm = max(sub, (tm // sub) * sub)
    tm = min(tm, rows_rounded)
    # Output-column tile: a multiple of 128 that divides n_feat, so the residual
    # slice of the (tm, H) x-block stays in bounds and stores stay lane-dense.
    tn = n_feat
    for cand in (256, 128):
        if n_feat % cand == 0:
            tn = cand
            break
    return tm, tn


# ----------------------------- standalone LN kernel --------------------------

def _layernorm_kernel(x_ref, a_ref, b_ref, o_ref, *, eps, n_feat):
    """Torch-style LayerNorm over the last axis of a (tr, H) block."""
    x = x_ref[...].astype(jnp.float32)                         # (tr, H)
    mean = jnp.sum(x, axis=-1, keepdims=True) * (1.0 / n_feat)  # (tr, 1)
    d = x - mean
    # torch.Tensor.std: unbiased (divide by N-1); two-pass formula is robust
    # to large DC offsets and is free in this DMA-bound kernel.
    var = jnp.sum(d * d, axis=-1, keepdims=True) * (1.0 / max(n_feat - 1, 1))
    inv = 1.0 / (jnp.sqrt(var) + eps)                           # (tr, 1) exact
    o_ref[...] = (d * inv * a_ref[...] + b_ref[...]).astype(o_ref.dtype)


def pallas_layernorm(x2d, a_2, b_2, eps=1e-6):
    """x2d: (R, H); a_2, b_2: (H,). Returns (R, H) LayerNorm'd rows."""
    R, H = x2d.shape
    tr = _choose_row_tile(R, H, x2d.dtype)
    n_blocks = pl.cdiv(R, tr)                   # partial last block handled by Pallas

    a2 = a_2.astype(jnp.float32).reshape(1, H)
    b2 = b_2.astype(jnp.float32).reshape(1, H)

    return pl.pallas_call(
        functools.partial(_layernorm_kernel, eps=eps, n_feat=H),
        out_shape=jax.ShapeDtypeStruct((R, H), x2d.dtype),
        grid_spec=pltpu.PrefetchScalarGridSpec(
            num_scalar_prefetch=0,
            grid=(n_blocks,),
            in_specs=[
                pl.BlockSpec((tr, H), lambda i: (i, 0)),
                pl.BlockSpec((1, H), lambda i: (0, 0)),    # a_2, resident
                pl.BlockSpec((1, H), lambda i: (0, 0)),    # b_2, resident
            ],
            out_specs=pl.BlockSpec((tr, H), lambda i: (i, 0)),
        ),
        compiler_params=pltpu.CompilerParams(
            dimension_semantics=("parallel",),
            vmem_limit_bytes=_VMEM_LIMIT_BYTES,
        ),
    )(x2d, a2, b2)


# --------------- fused LN -> linear (+bias) -> +x residual kernel ------------

def _fused_ln_linear_residual_kernel(x_ref, w_ref, a_ref, b_ref, bias_ref,
                                     o_ref, lhs_ref, *, eps, n_feat, tn):
    j = pl.program_id(1)

    # Compute the LayerNorm'd LHS tile once per row-block (j == 0) and cache it
    # in VMEM scratch; it is reused for every output-column tile j.
    @pl.when(j == 0)
    def _():
        x = x_ref[...].astype(jnp.float32)                          # (tm, H)
        mean = jnp.sum(x, axis=-1, keepdims=True) * (1.0 / n_feat)
        d = x - mean
        var = jnp.sum(d * d, axis=-1, keepdims=True) * (1.0 / max(n_feat - 1, 1))
        inv = 1.0 / (jnp.sqrt(var) + eps)
        lhs_ref[...] = (d * inv * a_ref[...] + b_ref[...]).astype(lhs_ref.dtype)

    y = jnp.dot(lhs_ref[...], w_ref[...], preferred_element_type=jnp.float32)
    y = y + bias_ref[...]                                            # (tm, tn)
    col = pl.multiple_of(j * tn, tn)
    res = x_ref[:, pl.ds(col, tn)].astype(jnp.float32)               # residual slice
    o_ref[...] = (res + y).astype(o_ref.dtype)


def pallas_fused_ln_linear_residual(x2d, weight, bias, a_2, b_2, eps=1e-6):
    """out = x2d + (LayerNorm(x2d) @ weight + bias), in a single Pallas kernel."""
    R, H = x2d.shape
    Hw, N = weight.shape
    assert Hw == H and N == H, "residual connection requires a square (H, H) projection"

    tm, tn = _choose_fused_tiles(R, H, x2d.dtype)
    n_i = pl.cdiv(R, tm)
    n_j = N // tn

    a2 = a_2.astype(jnp.float32).reshape(1, H)
    b2 = b_2.astype(jnp.float32).reshape(1, H)
    w_c = weight.astype(x2d.dtype)
    bias2 = (jnp.zeros((N,), jnp.float32) if bias is None
             else bias.astype(jnp.float32)).reshape(1, N)

    return pl.pallas_call(
        functools.partial(_fused_ln_linear_residual_kernel,
                          eps=eps, n_feat=H, tn=tn),
        out_shape=jax.ShapeDtypeStruct((R, N), x2d.dtype),
        grid_spec=pltpu.PrefetchScalarGridSpec(
            num_scalar_prefetch=0,
            grid=(n_i, n_j),
            in_specs=[
                pl.BlockSpec((tm, H), lambda i, j: (i, 0)),    # x rows (LN + residual)
                pl.BlockSpec((H, tn), lambda i, j: (0, j)),    # weight column tile
                pl.BlockSpec((1, H), lambda i, j: (0, 0)),     # a_2, resident
                pl.BlockSpec((1, H), lambda i, j: (0, 0)),     # b_2, resident
                pl.BlockSpec((1, tn), lambda i, j: (0, j)),    # bias tile
            ],
            out_specs=pl.BlockSpec((tm, tn), lambda i, j: (i, j)),
            scratch_shapes=[pltpu.VMEM((tm, H), x2d.dtype)],   # cached LN'd LHS
        ),
        compiler_params=pltpu.CompilerParams(
            # j must be sequential per core (scratch is filled at j == 0).
            dimension_semantics=("parallel", "arbitrary"),
            vmem_limit_bytes=_VMEM_LIMIT_BYTES,
        ),
    )(x2d, w_c, a2, b2, bias2)


# ----------------------------- module wrappers -------------------------------

class PallasLinear:
    """A known linear projection y = x @ weight + bias (enables the fused path)."""

    def __init__(self, weight, bias=None):
        self.weight = weight            # (H, H)
        self.bias = bias                # (H,) or None

    def __call__(self, x):
        y = jnp.dot(x, self.weight)
        if self.bias is not None:
            y = y + self.bias
        return y


class SublayerConnection:
    """JAX/Pallas port of the PyTorch SublayerConnection module (eval mode)."""

    def __init__(self, size, dropout, eps=1e-6):
        # LayerNorm params: a_2 = ones(size), b_2 = zeros(size)
        self.a_2 = jnp.ones((size,), dtype=jnp.float32)
        self.b_2 = jnp.zeros((size,), dtype=jnp.float32)
        self.eps = eps
        self.dropout_p = dropout        # eval-mode: identity
        # TODO(synk): training-mode stochastic dropout (pltpu.prng_*) not implemented.

    def __call__(self, x, sublayer):
        B, S, H = x.shape
        x2d = x.reshape(B * S, H)
        if isinstance(sublayer, PallasLinear) and sublayer.weight.shape == (H, H):
            # Fully fused LN -> matmul (+bias) -> +x residual: `normed` is never
            # written to HBM, removing 2 * R * H * itemsize of traffic.
            out2d = pallas_fused_ln_linear_residual(
                x2d, sublayer.weight, sublayer.bias, self.a_2, self.b_2, self.eps)
            return out2d.reshape(B, S, H)
        # Generic sublayer: standalone Pallas LN; the sublayer and the residual
        # add stay in plain JAX so XLA fuses the add into the sublayer epilogue.
        normed = pallas_layernorm(x2d, self.a_2, self.b_2, self.eps)
        sub_out = sublayer(normed.reshape(B, S, H))
        return x + sub_out.astype(x.dtype)


# ----------------------------- demo / check ---------------------------------

if __name__ == "__main__":
    B, S, H = 2, 8, 128                 # lane-dense hidden size (multiple of 128)
    key = jax.random.PRNGKey(0)
    kx, kw, kb = jax.random.split(key, 3)
    x = jax.random.normal(kx, (B, S, H), dtype=jnp.float32)
    W = jax.random.normal(kw, (H, H), dtype=jnp.float32) * 0.02
    bias = jax.random.normal(kb, (H,), dtype=jnp.float32) * 0.1

    module = SublayerConnection(size=H, dropout=0.1)

    # pure-JAX reference with identical (torch) LayerNorm semantics
    mean = jnp.mean(x, axis=-1, keepdims=True)
    var = jnp.sum((x - mean) ** 2, axis=-1, keepdims=True) / (H - 1)
    normed_ref = (x - mean) / (jnp.sqrt(var) + 1e-6)

    # 1) fused path: LN -> linear(+bias) -> +x residual in one Pallas kernel
    out_fused = module(x, PallasLinear(W, bias))
    out_fused = jax.block_until_ready(out_fused)
    ref_fused = x + (jnp.dot(normed_ref, W) + bias)
    assert out_fused.shape == (B, S, H)
    assert jnp.allclose(out_fused, ref_fused, atol=2e-3, rtol=2e-3), \
        "fused path mismatch vs reference"

    # 2) generic-sublayer path: standalone LN kernel + arbitrary callable
    def sublayer_fn(y):
        return jnp.tanh(jnp.dot(y, W))

    out_gen = module(x, sublayer_fn)
    out_gen = jax.block_until_ready(out_gen)
    ref_gen = x + jnp.tanh(jnp.dot(normed_ref, W))
    assert out_gen.shape == (B, S, H)
    assert jnp.allclose(out_gen, ref_gen, atol=2e-3, rtol=2e-3), \
        "generic path mismatch vs reference"

    print("KERNEL_OK")
</pallas_src>

<mosaic_0001>
module attributes {stable_mosaic.version = 11 : i64} {
  func.func @_fused_ln_linear_residual_kernel(%arg0: i32, %arg1: i32, %arg2: memref<8x128xf32, #tpu.memory_space<vmem>>, %arg3: memref<128x128xf32, #tpu.memory_space<vmem>>, %arg4: memref<1x128xf32, #tpu.memory_space<vmem>>, %arg5: memref<1x128xf32, #tpu.memory_space<vmem>>, %arg6: memref<1x128xf32, #tpu.memory_space<vmem>>, %arg7: memref<8x128xf32, #tpu.memory_space<vmem>>, %arg8: memref<8x128xf32, #tpu.memory_space<vmem>>) attributes {dimension_semantics = [#tpu.dimension_semantics<parallel>, #tpu.dimension_semantics<arbitrary>], iteration_bounds = array<i64: 2, 1>, scalar_prefetch = 0 : i64, scratch_operands = 1 : i64, tpu.core_type = #tpu.core_type<tc>, window_params = [{transform_indices = @transform_0, window_bounds = array<i64: 8, 128>}, {transform_indices = @transform_1, window_bounds = array<i64: 128, 128>}, {pipeline_mode = #tpu.pipeline_mode<synchronous>, transform_indices = @transform_2, window_bounds = array<i64: 1, 128>}, {pipeline_mode = #tpu.pipeline_mode<synchronous>, transform_indices = @transform_3, window_bounds = array<i64: 1, 128>}, {transform_indices = @transform_4, window_bounds = array<i64: 1, 128>}, {transform_indices = @transform_5, window_bounds = array<i64: 8, 128>}]} {
    %c0_i32 = arith.constant 0 : i32
    %0 = arith.cmpi eq, %arg1, %c0_i32 : i32
    %1 = arith.extui %0 : i1 to i32
    %c0_i32_0 = arith.constant 0 : i32
    %2 = arith.cmpi ne, %1, %c0_i32_0 : i32
    scf.if %2 {
      %c0_9 = arith.constant 0 : index
      %c0_10 = arith.constant 0 : index
      %15 = vector.load %arg2[%c0_9, %c0_10] : memref<8x128xf32, #tpu.memory_space<vmem>>, vector<8x128xf32>
      %cst_11 = arith.constant dense<0.000000e+00> : vector<8xf32>
      %16 = vector.multi_reduction <add>, %15, %cst_11 [1] : vector<8x128xf32> to vector<8xf32>
      %17 = vector.shape_cast %16 : vector<8xf32> to vector<8x1xf32>
      %cst_12 = arith.constant 7.812500e-03 : f32
      %18 = vector.broadcast %cst_12 : f32 to vector<8x1xf32>
      %19 = arith.mulf %17, %18 : vector<8x1xf32>
      %20 = vector.broadcast %19 : vector<8x1xf32> to vector<8x128xf32>
      %21 = arith.subf %15, %20 : vector<8x128xf32>
      %22 = arith.mulf %21, %21 : vector<8x128xf32>
      %cst_13 = arith.constant dense<0.000000e+00> : vector<8xf32>
      %23 = vector.multi_reduction <add>, %22, %cst_13 [1] : vector<8x128xf32> to vector<8xf32>
      %24 = vector.shape_cast %23 : vector<8xf32> to vector<8x1xf32>
      %cst_14 = arith.constant 0.00787401571 : f32
      %25 = vector.broadcast %cst_14 : f32 to vector<8x1xf32>
      %26 = arith.mulf %24, %25 : vector<8x1xf32>
      %27 = math.sqrt %26 : vector<8x1xf32>
      %cst_15 = arith.constant 9.99999997E-7 : f32
      %28 = vector.broadcast %cst_15 : f32 to vector<8x1xf32>
      %29 = arith.addf %27, %28 : vector<8x1xf32>
      %cst_16 = arith.constant 1.000000e+00 : f32
      %30 = vector.broadcast %cst_16 : f32 to vector<8x1xf32>
      %31 = arith.divf %30, %29 : vector<8x1xf32>
      %32 = vector.broadcast %31 : vector<8x1xf32> to vector<8x128xf32>
      %33 = arith.mulf %21, %32 : vector<8x128xf32>
      %c0_17 = arith.constant 0 : index
      %c0_18 = arith.constant 0 : index
      %34 = vector.load %arg4[%c0_17, %c0_18] : memref<1x128xf32, #tpu.memory_space<vmem>>, vector<1x128xf32>
      %35 = vector.broadcast %34 : vector<1x128xf32> to vector<8x128xf32>
      %36 = arith.mulf %33, %35 : vector<8x128xf32>
      %c0_19 = arith.constant 0 : index
      %c0_20 = arith.constant 0 : index
      %37 = vector.load %arg5[%c0_19, %c0_20] : memref<1x128xf32, #tpu.memory_space<vmem>>, vector<1x128xf32>
      %38 = vector.broadcast %37 : vector<1x128xf32> to vector<8x128xf32>
      %39 = arith.addf %36, %38 : vector<8x128xf32>
      %c0_21 = arith.constant 0 : index
      %c0_22 = arith.constant 0 : index
      %40 = vector.load %arg8[%c0_21, %c0_22] : memref<8x128xf32, #tpu.memory_space<vmem>>, vector<8x128xf32>
      tpu.vector_store %arg8[%c0_21, %c0_22], %39 {strides = array<i32>} : memref<8x128xf32, #tpu.memory_space<vmem>>, vector<8x128xf32>,
    } else {
    }
    %c0 = arith.constant 0 : index
    %c0_1 = arith.constant 0 : index
    %3 = vector.load %arg8[%c0, %c0_1] : memref<8x128xf32, #tpu.memory_space<vmem>>, vector<8x128xf32>
    %c0_2 = arith.constant 0 : index
    %c0_3 = arith.constant 0 : index
    %4 = vector.load %arg3[%c0_2, %c0_3] : memref<128x128xf32, #tpu.memory_space<vmem>>, vector<128x128xf32>
    %cst = arith.constant dense<0.000000e+00> : vector<8x128xf32>
    %5 = tpu.matmul %3, %4, %cst {dimension_numbers = #tpu.dot_dimension_numbers<[1], [0], [0], [1], [0, 0, 1, 1], [], []>} : vector<8x128xf32>, vector<128x128xf32>, vector<8x128xf32> -> vector<8x128xf32>
    %c0_4 = arith.constant 0 : index
    %c0_5 = arith.constant 0 : index
    %6 = vector.load %arg6[%c0_4, %c0_5] : memref<1x128xf32, #tpu.memory_space<vmem>>, vector<1x128xf32>
    %7 = vector.broadcast %6 : vector<1x128xf32> to vector<8x128xf32>
    %8 = arith.addf %5, %7 : vector<8x128xf32>
    %c128_i32 = arith.constant 128 : i32
    %9 = arith.muli %arg1, %c128_i32 : i32
    %10 = tpu.assume_multiple %9, 128 : i32
    %c0_6 = arith.constant 0 : index
    %11 = arith.index_cast %10 : i32 to index
    %12 = vector.load %arg2[%c0_6, %11] : memref<8x128xf32, #tpu.memory_space<vmem>>, vector<8x128xf32>
    %13 = arith.addf %12, %8 : vector<8x128xf32>
    %c0_7 = arith.constant 0 : index
    %c0_8 = arith.constant 0 : index
    %14 = vector.load %arg7[%c0_7, %c0_8] : memref<8x128xf32, #tpu.memory_space<vmem>>, vector<8x128xf32>
    tpu.vector_store %arg7[%c0_7, %c0_8], %13 {strides = array<i32>} : memref<8x128xf32, #tpu.memory_space<vmem>>, vector<8x128xf32>,
    return
  }
  func.func @transform_0(%arg0: i32, %arg1: i32) -> (i32, i32) {
    %c0_i32 = arith.constant 0 : i32
    %c0_i32_0 = arith.constant 0 : i32
    return %arg0, %c0_i32 : i32, i32
  }
  func.func @transform_1(%arg0: i32, %arg1: i32) -> (i32, i32) {
    %c0_i32 = arith.constant 0 : i32
    %c0_i32_0 = arith.constant 0 : i32
    return %c0_i32, %arg1 : i32, i32
  }
  func.func @transform_2(%arg0: i32, %arg1: i32) -> (i32, i32) {
    %c0_i32 = arith.constant 0 : i32
    %c0_i32_0 = arith.constant 0 : i32
    %c0_i32_1 = arith.constant 0 : i32
    return %c0_i32, %c0_i32_0 : i32, i32
  }
  func.func @transform_3(%arg0: i32, %arg1: i32) -> (i32, i32) {
    %c0_i32 = arith.constant 0 : i32
    %c0_i32_0 = arith.constant 0 : i32
    %c0_i32_1 = arith.constant 0 : i32
    return %c0_i32, %c0_i32_0 : i32, i32
  }
  func.func @transform_4(%arg0: i32, %arg1: i32) -> (i32, i32) {
    %c0_i32 = arith.constant 0 : i32
    %c0_i32_0 = arith.constant 0 : i32
    return %c0_i32, %arg1 : i32, i32
  }
  func.func @transform_5(%arg0: i32, %arg1: i32) -> (i32, i32) {
    %c0_i32 = arith.constant 0 : i32
    return %arg0, %arg1 : i32, i32
  }
}

</mosaic_0001>

<bundles_post_ra>
// kernel: tpu_custom_call.1
= control target key start
LH: loop header
LB: loop body
LE: loop exit
PB: predicated region body
PF: predicated region fallthrough
CT: control target
= control target key end

     0   :  { %10 = vsyncpa [#allocation4], 0  ;;  %s1144_s0 = inlined_call_operand.hbm [shape: f32[16,128], index: 0, kind: input, shape index: {}]   ;;  %s1145_s1 = inlined_call_operand.hbm [shape: f32[128,128], index: 1, kind: input, shape index: {}]   ;;  %s1146_s2 = inlined_call_operand.vmem [shape: f32[1,128], index: 2, kind: input, shape index: {}]   ;;  %s1147_s3 = inlined_call_operand.vmem [shape: f32[1,128], index: 3, kind: input, shape index: {}]   ;;  %s1148_s4 = inlined_call_operand.vmem [shape: f32[1,128], index: 4, kind: input, shape index: {}]   ;;  %s1149_s5 = inlined_call_operand.hbm [shape: f32[16,128], index: 5, kind: output, shape index: {}]  }
   0x1   :  { %12 = vsyncpa [#allocation4 + $0x1], 0 }
   0x2   :  { %13 = vsyncpa [#allocation7], 0 }
   0x3   :  { %14 = vsyncpa [#allocation5], 0 }
   0x4   :  { %16 = vsyncpa [#allocation5 + $0x1], 0  ;;  %s912_s18 = smov 0   ;;  %s914_s19 = smov 0  }
   0x5   :  { %s916_s20 = smov 0   ;;  %s918_s21 = smov 0  }
   0x6   :  { %s920_s22 = smov 0   ;;  %s922_s23 = smov 0  }
   0x7 LB: > { %s551_s24 = sadd.s32 4294967295, %s872_s23   ;;  %s552_s25 = sadd.s32 4294967294, %s872_s23   ;;  %s872_s23 = sphi %s922_s23, %s22_s23   ;;  %s868_s22 = sphi %s920_s22, %s1173_s22   ;;  %s864_s21 = sphi %s918_s21, %s1172_s21   ;;  %s860_s20 = sphi %s916_s20, %s1171_s20   ;;  %s856_s19 = sphi %s914_s19, %s1170_s19   ;;  %s852_s18 = sphi %s912_s18, %s1169_s18  }
   0x8   : > { %p54_p0 = scmp.ne.s32.totalorder %s856_s19, %s852_s18  ;;  %p946_p1 = scmp.eq.s32.totalorder %s551_s24, 0 }
   0x9   : > { %p950_p2 = scmp.eq.s32.totalorder %s551_s24, 1  ;;  %p180_p3 = scmp.eq.s32.totalorder %s552_s25, 1 }
   0xa   : > { %s1154_s26 = scalar_select %p946_p1, 1, 0 }
   0xb   : > { %s1155_s27 = scalar_select %p950_p2, 1, 0 }
   0xc   : > { %p956_p4 = por %p946_p1, %p54_p0  ;;  %p553_p5 = scmp.ge.s32.totalorder %s872_s23, 1 }
   0xd   : > { %p961_p6 = por %p180_p3, %p54_p0  ;;  %p187_p7 = scmp.lt.s32.totalorder %s872_s23, 3 }
   0xe   : > { %s1156_s28 = scalar_select %p956_p4, 1, 0 }
   0xf   : > { %s1157_s29 = scalar_select %p961_p6, 1, 0 }
  0x10   : > { %p966_p8 = pnand %p553_p5, %p187_p7  ;;  %s874_s6 = smov [#allocation6]  }
  0x11   : > { %s201_s7 = sshll.u32 %s874_s6, 4  ;;  %s34_s9 = sadd.s32 1, %s868_s22  ;;  %s202_s7 = int_to_ptr.vmem [resolvable:$true] %s201_s7 }
  0x12   : > { %s1158_s30 = scalar_select %p966_p8, 1, 0 }
  0x13   : > { %p654_p9 = pneg %p966_p8  ;;  %s728_s12 = scalar_lea.hbm %s1145_s1, 2048 }
  0x14   : > { %p729_p12 = scmp.ne.s32.totalorder %s1145_s1, %s728_s12  ;;  %p735_p5 = scmp.lt.u32.totalorder %s728_s12, %s1145_s1 }
  0x15   : > { %p975_p11 = pnand %p654_p9, %p946_p1 }
  0x17   : > { %p730_p13 = pneg %p975_p11 }
  0x19   : > { %p731_p0 = pnand %p730_p13, %p729_p12 }
  0x1b   : > { %p732_p3 = pneg %p731_p0 }
  0x1d   : > { %p737_p7 = pnand %p735_p5, %p732_p3 }
  0x1f   : > { %740 = shalt.err (!%p737_p7)
}
  0x20   : > { %s741_s17 = scalar_lea.vmem %s202_s7, 2048  ;;  %p749_p1 = scmp.lt.s32.totalorder %s202_s7, %s202_s7 }
  0x21   : > { %p742_p9 = scmp.ne.s32.totalorder %s202_s7, %s741_s17  ;;  %p750_p4 = scmp.lt.s32.totalorder %s741_s17, %s741_s17 }
  0x23   : > { %p744_p10 = pnand %p742_p9, %p730_p13  ;;  %p751_p8 = por %p750_p4, %p749_p1 }
  0x25   : > { %p745_p6 = pneg %p744_p10 }
  0x27   : > { %p752_p2 = pnand %p751_p8, %p745_p6 }
  0x29   : > { %755 = shalt.err (!%p752_p2)
}
  0x2a   : > { %s875_s24 = smov 128   ;;  %s876_s25 = smov 8  }
  0x2b   : > { %657 = dma.hbm_to_vmem [thread:$0]  (!%p975_p11), %s1145_s1, 2048, %s202_s7, [#allocation7], %s875_s24, %s875_s24, %s876_s25  }
  0x2c   : > { %p36_p1 = scmp.ge.s32.totalorder %s34_s9, 2  ;;  %s41_s11 = sadd.s32 1, %s860_s20 }
  0x2d   : > { %p48_p2 = scmp.ne.s32.totalorder %s860_s20, %s856_s19  ;;  %p49_p4 = scmp.eq.s32.totalorder %s872_s23, 0 }
  0x2e   : > { %s1175_s9 = smov (%p36_p1, %s34_s9), 0  ;;  %p1161_p8 = scmp.ne.s32.totalorder %s1155_s27, 0 }
  0x2f   : > { %p1002_p6 = por %p49_p4, %p48_p2  ;;  %s38_s8 = ssub.s32 %s868_s22, %s1175_s9 }
  0x30   : > { %p1008_p10 = por %p1161_p8, %p48_p2  ;;  %p667_p12 = scmp.lt.s32.totalorder %s872_s23, 2 }
  0x31   : > { %p39_p11 = scmp.eq.s32.totalorder %s38_s8, 0  ;;  %s227_s7 = sand.u32 1, %s860_s20  }
  0x32   : > { %s557_s14 = sshll.u32 %s227_s7, 3  ;;  %s558_s16 = sshll.u32 %s868_s22, 7 }
  0x33   : > { %s1017_s15 = scalar_select %p39_p11, %s860_s20, %s41_s11  }
  0x34   : > { %s1023_s25 = scalar_lea.hbm %s1144_s0, %s558_s16  ;;  %s231_s27 = scalar_lea.vmem [#allocation3], %s557_s14 }
  0x35   : > { %s238_s6 = sshll.u32 %s231_s27, 4  ;;  %p1029_p13 = pnand %p667_p12, %p1002_p6  ;;  %s1025_s6 = int_to_ptr.vmem [resolvable:$true] %s238_s6 }
  0x36   : > { %s228_s11 = scalar_lea.sflag [#allocation4], %s227_s7  ;;  %s756_s8 = scalar_lea.hbm %s1023_s25, 128 }
  0x37   : > { %p757_p0 = scmp.ne.s32.totalorder %s1023_s25, %s756_s8  ;;  %p758_p3 = pneg %p1029_p13 }
  0x38   : > { %s761_s17 = scalar_lea.hbm %s1144_s0, 256  ;;  %p762_p9 = scmp.lt.u32.totalorder %s1023_s25, %s1144_s0 }
  0x39   : > { %p759_p5 = pnand %p758_p3, %p757_p0  ;;  %p763_p1 = scmp.lt.u32.totalorder %s761_s17, %s756_s8 }
  0x3a   : > { %p765_p4 = scmp.lt.u32.totalorder %s756_s8, %s1023_s25 }
  0x3b   : > { %p760_p7 = pneg %p759_p5  ;;  %p764_p2 = por %p763_p1, %p762_p9 }
  0x3d   : > { %p766_p6 = por %p765_p4, %p764_p2 }
  0x3f   : > { %p767_p8 = pnand %p766_p6, %p760_p7 }
  0x41   : > { %770 = shalt.err (!%p767_p8)
}
  0x42   : > { %s771_s7 = scalar_lea.vmem %s1025_s6, 128  ;;  %s877_s27 = smov [#allocation3]  }
  0x43   : > { %p772_p12 = scmp.ne.s32.totalorder %s1025_s6, %s771_s7  ;;  %s776_s14 = sshll.u32 %s877_s27, 4  ;;  %s777_s14 = int_to_ptr.vmem [resolvable:$false] %s776_s14 }
  0x44   : > { %s778_s16 = scalar_lea.vmem %s777_s14, 256  ;;  %p779_p5 = scmp.lt.s32.totalorder %s1025_s6, %s777_s14 }
  0x45   : > { %p774_p11 = pnand %p772_p12, %p758_p3  ;;  %p780_p9 = scmp.lt.s32.totalorder %s778_s16, %s771_s7 }
  0x47   : > { %p775_p0 = pneg %p774_p11  ;;  %p781_p1 = por %p780_p9, %p779_p5 }
  0x49   : > { %p782_p2 = pnand %p781_p1, %p775_p0 }
  0x4b   : > { %785 = shalt.err (!%p782_p2)
}
  0x4c   : > { %661 = dma.hbm_to_vmem [thread:$0]  (!%p1029_p13), %s1023_s25, 128, %s1025_s6, %s228_s11  }
  0x4d   : > { %p1164_p7 = scmp.ne.s32.totalorder %s1158_s30, 0 }
  0x4e   : > { %s1061_s8 = sand.u32 (!%p1164_p7), 1, %s856_s19   ;;  %p1165_p3 = scmp.ne.s32.totalorder (!%p1164_p7), %s1156_s28, 0 }
  0x4f   : > { %247 = sbr.rel (%p1164_p7) target bundleno = 647 (0x287), region = 40  ;;  %s560_s17 = sshll.u32 (!%p1164_p7), %s1061_s8, 3 }
  0x50   : > { %s250_s12 = scalar_lea.sflag (!%p1164_p7), [#allocation4], %s1061_s8  ;;  %s253_s24 = scalar_lea.vmem (!%p1164_p7), [#allocation3], %s560_s17 }
  0x56   : > { %839 = dma.done.wait (%p1165_p3), %s250_s12, 128  }
  0x57   : > { %841 = vsyncadd (%p1165_p3), %s250_s12, 4294967168  ;;  %p1166_p13 = scmp.ne.s32.totalorder %s1154_s26, 0 }
  0x59   : > { %843 = dma.done.wait (%p1166_p13), [#allocation7], 2048  }
  0x5a   : > { %845 = vsyncadd (%p1166_p13), [#allocation7], 4294965248  ;;  %v1075_v0 = vld [vmem:[%s253_s24] sm:$0xff]  ;;  %v332_v5 = vld [vmem:[#allocation6] sm:$0xff]  ;;  %v878_v8 = vmov 0.0|0.0   ;;  %vm879_vm0 = vmmov 0  }
  0x5b   : > { %295 = vadd.xlane.f32.xlu0 %v1075_v0  ;;  %v333_v6 = vld [vmem:[#allocation6 + $0x8] sm:$0xff]  ;;  %622 = vmatprep.subr.bf16.mxu0 %v878_v8  ;;  %v334_v9 = vld [vmem:[#allocation6 + $0x10] sm:$0xff]  ;;  %v335_v10 = vld [vmem:[#allocation6 + $0x18] sm:$0xff]  ;;  %v880_v20 = vmov 0.0   ;;  %s567_s11 = sshll.u32 %s864_s21, 7  ;;  %s286_s7 = scalar_lea.vmem [#allocation8], %s560_s17 }
  0x5c   : > { %v623_v7 = vpack.c.bf16 %v333_v6, %v332_v5  ;;  %v626_v11 = vpack.c.bf16 %v335_v10, %v334_v9  ;;  %v336_v12 = vld [vmem:[#allocation6 + $0x20] sm:$0xff]  ;;  %v337_v13 = vld [vmem:[#allocation6 + $0x28] sm:$0xff]  ;;  %v338_v15 = vld [vmem:[#allocation6 + $0x30] sm:$0xff]  ;;  %619 = vmatprep.mubr.msk.f32.mxu0 %vm879_vm0, %v880_v20  ;;  %s447_s27 = sshll.u32 %s286_s7, 4  ;;  %s1095_s12 = scalar_lea.hbm %s1149_s5, %s567_s11  ;;  %s1097_s27 = int_to_ptr.vmem [resolvable:$true] %s447_s27 }
  0x5d   : > { %v629_v14 = vpack.c.bf16 %v337_v13, %v336_v12  ;;  %v339_v16 = vld [vmem:[#allocation6 + $0x38] sm:$0xff]  ;;  %v340_v18 = vld [vmem:[#allocation6 + $0x40] sm:$0xff]  ;;  %v341_v19 = vld [vmem:[#allocation6 + $0x48] sm:$0xff]  ;;  %s433_s24 = scalar_lea.sflag [#allocation5], %s1061_s8  ;;  %s786_s21 = scalar_lea.vmem %s1097_s27, 128 }
  0x5e   : > { %624 = vmatpush3.bf16.msra.mxu0 %v623_v7  ;;  %v632_v17 = vpack.c.bf16 %v339_v16, %v338_v15  ;;  %v635_v21 = vpack.c.bf16 %v341_v19, %v340_v18  ;;  %v342_v22 = vld [vmem:[#allocation6 + $0x50] sm:$0xff]  ;;  %v343_v23 = vld [vmem:[#allocation6 + $0x58] sm:$0xff]  ;;  %v344_v25 = vld [vmem:[#allocation6 + $0x60] sm:$0xff]  ;;  %p787_p4 = scmp.ne.s32.totalorder %s1097_s27, %s786_s21  ;;  %s881_s17 = smov [#allocation8]  }
  0x5f   : > { %625 = vmatprep.subr.bf16.mxu0 %v878_v8  ;;  %v638_v24 = vpack.c.bf16 %v343_v23, %v342_v22  ;;  %v345_v26 = vld [vmem:[#allocation6 + $0x68] sm:$0xff]  ;;  %v346_v28 = vld [vmem:[#allocation6 + $0x70] sm:$0xff]  ;;  %v347_v29 = vld [vmem:[#allocation6 + $0x78] sm:$0xff]  ;;  %s790_s26 = sshll.u32 %s881_s17, 4  ;;  %s791_s26 = int_to_ptr.vmem [resolvable:$false] %s790_s26 }
  0x60   : > { %v641_v27 = vpack.c.bf16 %v345_v26, %v344_v25  ;;  %v644_v30 = vpack.c.bf16 %v347_v29, %v346_v28  ;;  %v563_v40 = vld [vmem:[%s1146_s2] ss:$0 sm:$0xff]  ;;  %p788_p6 = pnand %p787_p4, %p1008_p10  ;;  %s792_s28 = scalar_lea.vmem %s791_s26, 256 }
  0x61   : > { %v564_v42 = vld [vmem:[%s1147_s3] ss:$0 sm:$0xff]  ;;  %p793_p12 = scmp.lt.s32.totalorder %s1097_s27, %s791_s26  ;;  %p794_p11 = scmp.lt.s32.totalorder %s792_s28, %s786_s21 }
  0x62   : > { %627 = vmatpush3.bf16.msra.mxu0 %v626_v11  ;;  %v565_v45 = vld [vmem:[%s1148_s4] ss:$0 sm:$0xff]  ;;  %p789_p8 = pneg %p788_p6 }
  0x63   : > { %628 = vmatprep.subr.bf16.mxu0 %v878_v8  ;;  %p795_p0 = por %p794_p11, %p793_p12 }
  0x65   : > { %p796_p5 = pnand %p795_p0, %p789_p8 }
  0x66   : > { %630 = vmatpush3.bf16.msra.mxu0 %v629_v14 }
  0x67   : > { %631 = vmatprep.subr.bf16.mxu0 %v878_v8 }
  0x6a   : > { %633 = vmatpush3.bf16.msra.mxu0 %v632_v17 }
  0x6b   : > { %634 = vmatprep.subr.bf16.mxu0 %v878_v8 }
  0x6e   : > { %636 = vmatpush3.bf16.msra.mxu0 %v635_v21 }
  0x6f   : > { %637 = vmatprep.subr.bf16.mxu0 %v878_v8 }
  0x72   : > { %639 = vmatpush3.bf16.msra.mxu0 %v638_v24 }
  0x73   : > { %640 = vmatprep.subr.bf16.mxu0 %v878_v8 }
  0x76   : > { %642 = vmatpush3.bf16.msra.mxu0 %v641_v27 }
  0x77   : > { %643 = vmatprep.subr.bf16.mxu0 %v878_v8 }
  0x7a   : > { %645 = vmatpush3.bf16.msra.mxu0 %v644_v30 }
  0xe8   : > { %v296_v1 = vpop.xlane.xlu0 %295 }
  0xe9   : > { %v297_v2 = vmul.f32 0.0078125, %v296_v1 }
  0xeb   : > { %v298_v3 = vsub.f32 %v1075_v0, %v297_v2 }
  0xed   : > { %v299_v4 = vmul.f32 %v298_v3, %v298_v3 }
  0xef   : > { %300 = vadd.xlane.f32.xlu0 %v299_v4 }
 0x17c   : > { %v301_v31 = vpop.xlane.xlu0 %300 }
 0x17d   : > { %v302_v32 = vmul.f32 0.007874016, %v301_v31 }
 0x17f   : > { %724 = vrsqrt.f32 %v302_v32  ;;  %vm305_vm1 = vcmp.eq.f32.partialorder %v302_v32, inf  ;;  %v308_v35 = vand.u32 2147483648, %v302_v32  ;;  %vm307_vm2 = vcmp.eq.f32.partialorder %v302_v32, 0.0 }
 0x189   : > { %v725_v33 = vpop.eup %724 }
 0x18a   : > { %v304_v34 = vmul.f32 %v725_v33, %v302_v32 }
 0x18c   : > { %v306_v36 = vsel %vm305_vm1, %v302_v32, %v304_v34 }
 0x18d   : > { %v309_v37 = vsel %vm307_vm2, %v308_v35, %v306_v36 }
 0x18e   : > { %v310_v38 = vadd.f32 1e-06, %v309_v37 }
 0x190   : > { %726 = vrcp.f32 %v310_v38 }
 0x19a   : > { %v727_v39 = vpop.eup %726 }
 0x19b   : > { %v313_v41 = vmul.f32 %v727_v39, %v298_v3 }
 0x19d   : > { %v321_v43 = vmul.f32 %v563_v40, %v313_v41 }
 0x19f   : > { %v329_v44 = vadd.f32 %v564_v42, %v321_v43 }
 0x1a1   : > { %620 = vmatmul.mubr.f32.vlgmr.msra.gmra.mrb[0].mxu0 %v329_v44 }
 0x274   : > { %v421_v46 = vpop.f32.mrb[0].mxu0 }
 0x275   : > { %v422_v47 = vadd.f32 %v565_v45, %v421_v46  ;;  %v621_v48 = vpop.f32.mrb[1].mxu0 }
 0x277   : > { %v430_v49 = vadd.f32 %v422_v47, %v1075_v0 }
 0x279   : > { %431 = vst [vmem:[%s286_s7] sm:$0xff] %v430_v49 }
 0x27a   : > { %799 = shalt.err (!%p796_p5)
}
 0x27b   : > { %s800_s8 = scalar_lea.hbm %s1095_s12, 128  ;;  %s804_s6 = scalar_lea.hbm %s1149_s5, 256 }
 0x27c   : > { %p801_p9 = scmp.ne.s32.totalorder %s1095_s12, %s800_s8  ;;  %p805_p7 = scmp.lt.u32.totalorder %s1095_s12, %s1149_s5 }
 0x27d   : > { %p806_p3 = scmp.lt.u32.totalorder %s804_s6, %s800_s8  ;;  %p808_p4 = scmp.lt.u32.totalorder %s800_s8, %s1095_s12 }
 0x27e   : > { %p802_p1 = pnand %p801_p9, %p1008_p10 }
 0x27f   : > { %p807_p13 = por %p806_p3, %p805_p7 }
 0x280   : > { %p803_p2 = pneg %p802_p1 }
 0x281   : > { %p809_p6 = por %p808_p4, %p807_p13 }
 0x283   : > { %p810_p8 = pnand %p809_p6, %p803_p2 }
 0x285   : > { %813 = shalt.err (!%p810_p8)
}
 0x286   : > { %652 = dma.vmem_to_hbm [thread:$0]  (%p1008_p10), %s1097_s27, 128, %s1095_s12, %s433_s24  }
 0x287 PF: > { %s459_s7 = sand.u32 1, %s852_s18   ;;  %p1167_p12 = scmp.ne.s32.totalorder %s1157_s29, 0 }
 0x288   : > { %p1168_p11 = scmp.ge.s32.totalorder %s872_s23, 2  ;;  %s460_s14 = scalar_lea.sflag [#allocation5], %s459_s7 }
 0x28a   : > { %p663_p0 = pnand %p1168_p11, %p1167_p12 }
 0x28c   : > { %847 = dma.done.wait (!%p663_p0), %s460_s14, 128  }
 0x28d   : > { %849 = vsyncadd (!%p663_p0), %s460_s14, 4294967168  ;;  %s22_s23 = sadd.s32 1, %s872_s23   ;;  %s1169_s18 = smov %s856_s19 }
 0x28e   : > { %p19_p5 = scmp.ge.s32.totalorder %s22_s23, 4   ;;  %s1170_s19 = smov %s860_s20 }
 0x28f   : > { %s1171_s20 = smov %s1017_s15  ;;  %s1172_s21 = smov %s868_s22 }
 0x290   : > { %s1173_s22 = smov %s1175_s9  ;;  %21 = sbr.rel (!%p19_p5) target bundleno = 7 (0x7), region = 98 }
 0x297   :  { %465 = vsyncpa [#allocation4], 1 }
 0x298   :  { %467 = vsyncpa [#allocation4 + $0x1], 1 }
 0x299   :  { %468 = vsyncpa [#allocation7], 1 }
 0x29a   :  { %469 = vsyncpa [#allocation5], 1 }
 0x29b   :  { %471 = vsyncpa [#allocation5 + $0x1], 1 }

</bundles_post_ra>
